<compile_context>
chip_gen: v5e
topology: v5e:2x2
jax: 0.10.0
libtpu: 0.0.40
codegen_flags: <defaults>
</compile_context>

<pallas_src>
import functools
from typing import NamedTuple

import jax
import jax.numpy as jnp
from jax.experimental import pallas as pl
from jax.experimental.pallas import tpu as pltpu


def _round_up(x, m):
    return (x + m - 1) // m * m


# ---------------------------------------------------------------------------
# Kernel
# ---------------------------------------------------------------------------
def decoder_kernel(z_ref, w1_ref, b1_ref, w2_ref, b2_ref, o_ref):
    # fc1: (tm, z_dim) @ (z_dim, h_pad) -> f32 accumulation on the MXU.
    h = jnp.dot(z_ref[...], w1_ref[...], preferred_element_type=jnp.float32)
    # Bias + LeakyReLU(0.01) stay in f32 on the VPU (v5e has no bf16 VALU).
    h = h + b1_ref[...]                       # (1, h_pad) broadcasts over rows
    h = jnp.maximum(h, 0.01 * h)              # LeakyReLU: 2 VALU ops/elem
    # fc2: cast only the MXU operand to the weight dtype, accumulate in f32.
    out = jnp.dot(h.astype(w2_ref.dtype), w2_ref[...],
                  preferred_element_type=jnp.float32)
    o_ref[...] = (out + b2_ref[...]).astype(o_ref.dtype)


# ---------------------------------------------------------------------------
# One-time parameter preparation (hoisted out of the per-call wrapper)
# ---------------------------------------------------------------------------
class DecoderParams(NamedTuple):
    w1: jax.Array   # (z_dim, h_pad)   compute dtype
    b1: jax.Array   # (1,     h_pad)   float32
    w2: jax.Array   # (h_pad, x_pad)   compute dtype
    b2: jax.Array   # (1,     x_pad)   float32


def prepare_decoder_params(w1, b1, w2, b2, *, compute_dtype=jnp.bfloat16):
    """Pad h_dim / x_dim to lane-dense multiples of 128 and cast the MXU
    operands to `compute_dtype` (None -> f32).  Call ONCE at setup, not per
    forward.  Zero padding is exact: LeakyReLU(0)=0 and zero rows/cols of w2
    contribute nothing; padded output columns are sliced off by the wrapper."""
    z_dim, h_dim = w1.shape
    h_dim2, x_dim = w2.shape
    assert h_dim2 == h_dim, (w1.shape, w2.shape)
    h_pad = _round_up(h_dim, 128)
    x_pad = _round_up(x_dim, 128)
    cdt = jnp.float32 if compute_dtype is None else compute_dtype
    w1p = jnp.pad(w1.astype(cdt), ((0, 0), (0, h_pad - h_dim)))
    b1p = jnp.pad(b1.astype(jnp.float32).reshape(1, h_dim),
                  ((0, 0), (0, h_pad - h_dim)))
    w2p = jnp.pad(w2.astype(cdt), ((0, h_pad - h_dim), (0, x_pad - x_dim)))
    b2p = jnp.pad(b2.astype(jnp.float32).reshape(1, x_dim),
                  ((0, 0), (0, x_pad - x_dim)))
    return DecoderParams(w1p, b1p, w2p, b2p)


# ---------------------------------------------------------------------------
# Single-buffering probe for resident operands (pipeline_mode=pl.Buffered(1))
# ---------------------------------------------------------------------------
def _copy_kernel(x_ref, o_ref):
    o_ref[...] = x_ref[...]


@functools.lru_cache(maxsize=None)
def _single_buffer_ok():
    """Probe whether pl.Buffered(1) (single-buffered resident operand) lowers
    cleanly on this backend; fall back to default double buffering if not."""
    try:
        x = jnp.zeros((16, 128), jnp.float32)
        f = pl.pallas_call(
            _copy_kernel,
            out_shape=jax.ShapeDtypeStruct((16, 128), jnp.float32),
            grid=(2,),
            in_specs=[pl.BlockSpec((8, 128), lambda i: (0, 0),
                                   pipeline_mode=pl.Buffered(1))],
            out_specs=pl.BlockSpec((8, 128), lambda i: (i, 0)),
        )
        jax.block_until_ready(f(x))
        return True
    except Exception:
        return False


# ---------------------------------------------------------------------------
# VMEM budgeting
# ---------------------------------------------------------------------------
def _vmem_need_bytes(tm, z_dim, h_pad, x_pad, in_bytes, w_bytes, out_bytes,
                     weight_bufs):
    # Streamed operands (z tile, out tile) are double-buffered by the pipeline.
    streamed = 2 * tm * z_dim * in_bytes + 2 * tm * x_pad * out_bytes
    # Resident operands (constant index_map): weights + sublane-padded biases.
    resident = weight_bufs * (z_dim * h_pad * w_bytes
                              + h_pad * x_pad * w_bytes
                              + 8 * (h_pad + x_pad) * 4)
    # f32 intermediates live inside one grid step (h and the f32 out tile).
    live = tm * (h_pad + x_pad) * 4
    return streamed + resident + live


def _vmem_limit_bytes(need_bytes):
    try:
        cap = int(pltpu.get_tpu_info().vmem_capacity_bytes)
    except Exception:
        cap = 64 << 20   # v7x physical per-TC floor; v5e/v6e have 128 MiB.
    return int(min(max(2 * need_bytes, 32 << 20), cap))


# ---------------------------------------------------------------------------
# Forward wrapper
# ---------------------------------------------------------------------------
def decoder_forward(z, params: DecoderParams, x_dim, *, block_rows=512,
                    out_dtype=None, target_grid_steps=4):
    """Fused decoder forward: LeakyReLU(z @ w1 + b1) @ w2 + b2.

    z:       (B, z_dim)
    params:  from prepare_decoder_params (lane-padded, compute-dtype weights)
    x_dim:   original (un-padded) output width
    out_dtype: output dtype (default: z.dtype); pass jnp.bfloat16 to halve the
               dominant output HBM stream when the consumer tolerates it.
    """
    out_dtype = z.dtype if out_dtype is None else out_dtype
    B, z_dim = z.shape
    assert params.w1.shape[0] == z_dim, (params.w1.shape, z.shape)
    h_pad = params.w1.shape[1]
    x_pad = params.w2.shape[1]

    # MXU operands in the compute dtype; accumulation / epilogue stay f32.
    z = z.astype(params.w1.dtype)

    # Row tile: large enough to amortize the ~0.35us/step grid overhead, small
    # enough to leave >= target_grid_steps steps (v7x megacore + DMA overlap
    # for the streamed z / out tiles); shrink if the VMEM budget is tight.
    tm = max(8, min(block_rows, _round_up(pl.cdiv(B, target_grid_steps), 8)))
    weight_bufs = 1 if _single_buffer_ok() else 2
    in_bytes = z.dtype.itemsize
    w_bytes = params.w2.dtype.itemsize
    o_bytes = jnp.dtype(out_dtype).itemsize
    vmem_soft_cap = 48 << 20
    while tm > 8 and _vmem_need_bytes(tm, z_dim, h_pad, x_pad, in_bytes,
                                      w_bytes, o_bytes, weight_bufs) > vmem_soft_cap:
        tm = max(8, _round_up(tm // 2, 8))
    # NOTE: if h_pad*x_pad alone ever approaches VMEM (huge decoders), add a
    # second "parallel" grid axis tiling x_pad (stream w2/b2 column tiles).

    need = _vmem_need_bytes(tm, z_dim, h_pad, x_pad, in_bytes, w_bytes,
                            o_bytes, weight_bufs)
    grid = (pl.cdiv(B, tm),)   # boundary block masked; no batch-padding copy

    resident = {"pipeline_mode": pl.Buffered(1)} if weight_bufs == 1 else {}

    out = pl.pallas_call(
        decoder_kernel,
        out_shape=jax.ShapeDtypeStruct((B, x_pad), out_dtype),
        grid_spec=pltpu.PrefetchScalarGridSpec(
            num_scalar_prefetch=0,
            grid=grid,
            in_specs=[
                pl.BlockSpec((tm, z_dim), lambda i: (i, 0)),                 # streamed
                pl.BlockSpec((z_dim, h_pad), lambda i: (0, 0), **resident),  # resident
                pl.BlockSpec((1, h_pad), lambda i: (0, 0), **resident),      # resident
                pl.BlockSpec((h_pad, x_pad), lambda i: (0, 0), **resident),  # resident
                pl.BlockSpec((1, x_pad), lambda i: (0, 0), **resident),      # resident
            ],
            out_specs=pl.BlockSpec((tm, x_pad), lambda i: (i, 0)),
        ),
        compiler_params=pltpu.CompilerParams(
            dimension_semantics=("parallel",),          # megacore sharding on v7x
            vmem_limit_bytes=_vmem_limit_bytes(need),
        ),
    )(z, params.w1, params.b1, params.w2, params.b2)

    return out[:, :x_dim]


# ---------------------------------------------------------------------------
# Reference + init helpers
# ---------------------------------------------------------------------------
def init_decoder_params(key, x_dim, h_dim, z_dim, dtype=jnp.float32):
    """Deterministic init mimicking nn.Linear default (uniform +/- 1/sqrt(fan_in))."""
    k1, k2, k3, k4 = jax.random.split(key, 4)
    bound1 = 1.0 / jnp.sqrt(z_dim)
    bound2 = 1.0 / jnp.sqrt(h_dim)
    # stored transposed vs. PyTorch's (out, in) convention -> (in, out)
    w1 = jax.random.uniform(k1, (z_dim, h_dim), dtype, -bound1, bound1)
    b1 = jax.random.uniform(k2, (1, h_dim), dtype, -bound1, bound1)
    w2 = jax.random.uniform(k3, (h_dim, x_dim), dtype, -bound2, bound2)
    b2 = jax.random.uniform(k4, (1, x_dim), dtype, -bound2, bound2)
    return w1, b1, w2, b2


def decoder_reference(z, w1, b1, w2, b2):
    h = z @ w1 + b1
    h = jnp.where(h > 0, h, 0.01 * h)
    return h @ w2 + b2


if __name__ == "__main__":
    # Small shapes implied by the module: batch=8, z_dim=16, h_dim=32, x_dim=64.
    B, z_dim, h_dim, x_dim = 8, 16, 32, 64

    key = jax.random.PRNGKey(0)
    kz, kp = jax.random.split(key)
    z = jax.random.normal(kz, (B, z_dim), jnp.float32)
    w1, b1, w2, b2 = init_decoder_params(kp, x_dim, h_dim, z_dim)

    ref = decoder_reference(z, w1, b1, w2, b2)

    # Default path: bf16 MXU operands (right on v5e/v6e/v7x), f32 accumulation
    # and f32 epilogue -> bf16-rounding-level agreement with the f32 reference.
    params_bf16 = prepare_decoder_params(w1, b1, w2, b2, compute_dtype=jnp.bfloat16)
    out_bf16 = jax.block_until_ready(decoder_forward(z, params_bf16, x_dim))
    assert out_bf16.shape == (B, x_dim), out_bf16.shape
    assert jnp.allclose(out_bf16, ref, atol=5e-2, rtol=5e-2), "bf16 mismatch vs reference"

    # Full f32 path: near-exact vs reference.
    params_f32 = prepare_decoder_params(w1, b1, w2, b2, compute_dtype=None)
    out_f32 = jax.block_until_ready(decoder_forward(z, params_f32, x_dim))
    assert out_f32.shape == (B, x_dim), out_f32.shape
    assert jnp.allclose(out_f32, ref, atol=1e-5, rtol=1e-5), "f32 mismatch vs reference"

    print("KERNEL_OK")
</pallas_src>

<mosaic_0001>
module attributes {stable_mosaic.version = 11 : i64} {
  func.func @_copy_kernel(%arg0: i32, %arg1: memref<8x128xf32, #tpu.memory_space<vmem>>, %arg2: memref<8x128xf32, #tpu.memory_space<vmem>>) attributes {dimension_semantics = [#tpu.dimension_semantics<arbitrary>], iteration_bounds = array<i64: 2>, scalar_prefetch = 0 : i64, scratch_operands = 0 : i64, tpu.core_type = #tpu.core_type<tc>, window_params = [{pipeline_mode = #tpu.pipeline_mode<synchronous>, transform_indices = @transform_0, window_bounds = array<i64: 8, 128>}, {transform_indices = @transform_1, window_bounds = array<i64: 8, 128>}]} {
    %c0 = arith.constant 0 : index
    %c0_0 = arith.constant 0 : index
    %0 = vector.load %arg1[%c0, %c0_0] : memref<8x128xf32, #tpu.memory_space<vmem>>, vector<8x128xf32>
    %c0_1 = arith.constant 0 : index
    %c0_2 = arith.constant 0 : index
    %1 = vector.load %arg2[%c0_1, %c0_2] : memref<8x128xf32, #tpu.memory_space<vmem>>, vector<8x128xf32>
    tpu.vector_store %arg2[%c0_1, %c0_2], %0 {strides = array<i32>} : memref<8x128xf32, #tpu.memory_space<vmem>>, vector<8x128xf32>,
    return
  }
  func.func @transform_0(%arg0: i32) -> (i32, i32) {
    %c0_i32 = arith.constant 0 : i32
    %c0_i32_0 = arith.constant 0 : i32
    %c0_i32_1 = arith.constant 0 : i32
    return %c0_i32, %c0_i32_0 : i32, i32
  }
  func.func @transform_1(%arg0: i32) -> (i32, i32) {
    %c0_i32 = arith.constant 0 : i32
    %c0_i32_0 = arith.constant 0 : i32
    return %arg0, %c0_i32 : i32, i32
  }
}

module attributes {stable_mosaic.version = 11 : i64} {
  func.func @decoder_kernel(%arg0: i32, %arg1: memref<8x16xbf16, #tpu.memory_space<vmem>>, %arg2: memref<16x128xbf16, #tpu.memory_space<vmem>>, %arg3: memref<1x128xf32, #tpu.memory_space<vmem>>, %arg4: memref<128x128xbf16, #tpu.memory_space<vmem>>, %arg5: memref<1x128xf32, #tpu.memory_space<vmem>>, %arg6: memref<8x128xf32, #tpu.memory_space<vmem>>) attributes {dimension_semantics = [#tpu.dimension_semantics<parallel>], iteration_bounds = array<i64: 1>, scalar_prefetch = 0 : i64, scratch_operands = 0 : i64, tpu.core_type = #tpu.core_type<tc>, window_params = [{transform_indices = @transform_0, window_bounds = array<i64: 8, 16>}, {pipeline_mode = #tpu.pipeline_mode<synchronous>, transform_indices = @transform_1, window_bounds = array<i64: 16, 128>}, {pipeline_mode = #tpu.pipeline_mode<synchronous>, transform_indices = @transform_2, window_bounds = array<i64: 1, 128>}, {pipeline_mode = #tpu.pipeline_mode<synchronous>, transform_indices = @transform_3, window_bounds = array<i64: 128, 128>}, {pipeline_mode = #tpu.pipeline_mode<synchronous>, transform_indices = @transform_4, window_bounds = array<i64: 1, 128>}, {transform_indices = @transform_5, window_bounds = array<i64: 8, 128>}]} {
    %c0 = arith.constant 0 : index
    %c0_0 = arith.constant 0 : index
    %0 = vector.load %arg1[%c0, %c0_0] : memref<8x16xbf16, #tpu.memory_space<vmem>>, vector<8x16xbf16>
    %c0_1 = arith.constant 0 : index
    %c0_2 = arith.constant 0 : index
    %1 = vector.load %arg2[%c0_1, %c0_2] : memref<16x128xbf16, #tpu.memory_space<vmem>>, vector<16x128xbf16>
    %cst = arith.constant dense<0.000000e+00> : vector<8x128xf32>
    %2 = tpu.matmul %0, %1, %cst {dimension_numbers = #tpu.dot_dimension_numbers<[1], [0], [0], [1], [0, 0, 1, 1], [], []>} : vector<8x16xbf16>, vector<16x128xbf16>, vector<8x128xf32> -> vector<8x128xf32>
    %c0_3 = arith.constant 0 : index
    %c0_4 = arith.constant 0 : index
    %3 = vector.load %arg3[%c0_3, %c0_4] : memref<1x128xf32, #tpu.memory_space<vmem>>, vector<1x128xf32>
    %4 = vector.broadcast %3 : vector<1x128xf32> to vector<8x128xf32>
    %5 = arith.addf %2, %4 : vector<8x128xf32>
    %cst_5 = arith.constant 0.00999999977 : f32
    %6 = vector.broadcast %cst_5 : f32 to vector<8x128xf32>
    %7 = arith.mulf %6, %5 : vector<8x128xf32>
    %8 = arith.maximumf %5, %7 : vector<8x128xf32>
    %9 = arith.truncf %8 : vector<8x128xf32> to vector<8x128xbf16>
    %c0_6 = arith.constant 0 : index
    %c0_7 = arith.constant 0 : index
    %10 = vector.load %arg4[%c0_6, %c0_7] : memref<128x128xbf16, #tpu.memory_space<vmem>>, vector<128x128xbf16>
    %cst_8 = arith.constant dense<0.000000e+00> : vector<8x128xf32>
    %11 = tpu.matmul %9, %10, %cst_8 {dimension_numbers = #tpu.dot_dimension_numbers<[1], [0], [0], [1], [0, 0, 1, 1], [], []>} : vector<8x128xbf16>, vector<128x128xbf16>, vector<8x128xf32> -> vector<8x128xf32>
    %c0_9 = arith.constant 0 : index
    %c0_10 = arith.constant 0 : index
    %12 = vector.load %arg5[%c0_9, %c0_10] : memref<1x128xf32, #tpu.memory_space<vmem>>, vector<1x128xf32>
    %13 = vector.broadcast %12 : vector<1x128xf32> to vector<8x128xf32>
    %14 = arith.addf %11, %13 : vector<8x128xf32>
    %c0_11 = arith.constant 0 : index
    %c0_12 = arith.constant 0 : index
    %15 = vector.load %arg6[%c0_11, %c0_12] : memref<8x128xf32, #tpu.memory_space<vmem>>, vector<8x128xf32>
    tpu.vector_store %arg6[%c0_11, %c0_12], %14 {strides = array<i32>} : memref<8x128xf32, #tpu.memory_space<vmem>>, vector<8x128xf32>,
    return
  }
  func.func @transform_0(%arg0: i32) -> (i32, i32) {
    %c0_i32 = arith.constant 0 : i32
    %c0_i32_0 = arith.constant 0 : i32
    return %arg0, %c0_i32 : i32, i32
  }
  func.func @transform_1(%arg0: i32) -> (i32, i32) {
    %c0_i32 = arith.constant 0 : i32
    %c0_i32_0 = arith.constant 0 : i32
    %c0_i32_1 = arith.constant 0 : i32
    return %c0_i32, %c0_i32_0 : i32, i32
  }
  func.func @transform_2(%arg0: i32) -> (i32, i32) {
    %c0_i32 = arith.constant 0 : i32
    %c0_i32_0 = arith.constant 0 : i32
    %c0_i32_1 = arith.constant 0 : i32
    return %c0_i32, %c0_i32_0 : i32, i32
  }
  func.func @transform_3(%arg0: i32) -> (i32, i32) {
    %c0_i32 = arith.constant 0 : i32
    %c0_i32_0 = arith.constant 0 : i32
    %c0_i32_1 = arith.constant 0 : i32
    return %c0_i32, %c0_i32_0 : i32, i32
  }
  func.func @transform_4(%arg0: i32) -> (i32, i32) {
    %c0_i32 = arith.constant 0 : i32
    %c0_i32_0 = arith.constant 0 : i32
    %c0_i32_1 = arith.constant 0 : i32
    return %c0_i32, %c0_i32_0 : i32, i32
  }
  func.func @transform_5(%arg0: i32) -> (i32, i32) {
    %c0_i32 = arith.constant 0 : i32
    %c0_i32_0 = arith.constant 0 : i32
    return %arg0, %c0_i32 : i32, i32
  }
}

</mosaic_0001>

<bundles_post_ra>
// kernel: tpu_custom_call.1
= control target key start
LH: loop header
LB: loop body
LE: loop exit
PB: predicated region body
PF: predicated region fallthrough
CT: control target
= control target key end

     0   :  { %6 = vsyncpa [#allocation3], 0  ;;  %s440_s0 = inlined_call_operand.hbm [shape: f32[16,128], index: 0, kind: input, shape index: {}]   ;;  %s441_s1 = inlined_call_operand.hbm [shape: f32[16,128], index: 1, kind: output, shape index: {}]  }
   0x1   :  { %7 = vsyncpa [#allocation4], 0 }
   0x2   :  { %9 = vsyncpa [#allocation4 + $0x1], 0  ;;  %s356_s6 = smov 0   ;;  %s358_s7 = smov 0  }
   0x3   :  { %s360_s8 = smov 0   ;;  %s362_s9 = smov 0  }
   0x4 LB: > { %s377_s10 = sadd.s32 4294967295, %s343_s9   ;;  %s187_s11 = sadd.s32 4294967294, %s343_s9   ;;  %s343_s9 = sphi %s362_s9, %s447_s9   ;;  %s339_s8 = sphi %s360_s8, %s446_s8   ;;  %s335_s7 = sphi %s358_s7, %s445_s7   ;;  %s331_s6 = sphi %s356_s6, %s444_s6  }
   0x5   : > { %s381_s12 = sadd.s32 1, %s343_s9   ;;  %s43_s13 = sadd.s32 1, %s339_s8 }
   0x6   : > { %s40_s14 = ssub.s32 %s343_s9, %s381_s12  ;;  %p53_p0 = scmp.ne.s32.totalorder %s339_s8, %s335_s7 }
   0x7   : > { %p41_p1 = scmp.eq.s32.totalorder %s40_s14, 0  ;;  %p54_p2 = scmp.eq.s32.totalorder %s377_s10, 1 }
   0x8   : > { %p59_p3 = scmp.ne.s32.totalorder %s335_s7, %s331_s6  ;;  %p60_p4 = scmp.eq.s32.totalorder %s187_s11, 1 }
   0x9   : > { %s392_s15 = scalar_select %p41_p1, %s339_s8, %s43_s13  }
   0xa   : > { %p394_p5 = por %p54_p2, %p53_p0  ;;  %p398_p6 = por %p60_p4, %p59_p3 }
   0xb   : > { %p188_p7 = scmp.ge.s32.totalorder %s343_s9, 1  ;;  %p67_p8 = scmp.lt.s32.totalorder %s343_s9, 3 }
   0xc   : > { %p211_p9 = scmp.eq.s32.totalorder %s377_s10, 0  ;;  %s79_s20 = sshll.u32 %s440_s0, 4  ;;  %s80_s20 = int_to_ptr.hbm [resolvable:$true] %s79_s20 }
   0xd   : > { %p68_p10 = pnand %p188_p7, %p67_p8  ;;  %s345_s21 = smov [#allocation2]  }
   0xe   : > { %s81_s22 = sshll.u32 %s345_s21, 4  ;;  %s82_s22 = int_to_ptr.vmem [resolvable:$true] %s81_s22 }
   0xf   : > { %p203_p11 = pneg %p68_p10  ;;  %94 = sbr.rel (%p68_p10) target bundleno = 37 (0x25), region = 24 }
  0x11   : > { %p204_p12 = pnand %p211_p9, %p203_p11 }
  0x13   : > { %206 = dma.hbm_to_vmem [thread:$0]  (!%p204_p12), %s80_s20, 128, %s82_s22, [#allocation3]  }
  0x14   : > { %322 = dma.done.wait (%p211_p9), [#allocation3], 128  }
  0x15   : > { %324 = vsyncadd (%p211_p9), [#allocation3], 4294967168  ;;  %s107_s23 = sand.u32 1, %s335_s7   ;;  %s194_s24 = sshll.u32 %s377_s10, 3  ;;  %v110_v0 = vld [vmem:[#allocation2] sm:$0xff] }
  0x16   : > { %s192_s25 = sshll.u32 %s107_s23, 3  ;;  %s123_s28 = scalar_lea.hbm %s441_s1, %s194_s24 }
  0x17   : > { %s109_s29 = scalar_lea.vmem [#allocation5], %s192_s25  ;;  %s127_s2 = sshll.u32 %s123_s28, 4  ;;  %s128_s2 = int_to_ptr.hbm [resolvable:$true] %s127_s2 }
  0x18   : > { %s125_s30 = sshll.u32 %s109_s29, 4  ;;  %111 = vst [vmem:[%s109_s29] sm:$0xff] %v110_v0  ;;  %s113_s3 = scalar_lea.sflag [#allocation4], %s107_s23  ;;  %s126_s30 = int_to_ptr.vmem [resolvable:$true] %s125_s30 }
  0x19   : > { %s291_s4 = sshra.s32 %s128_s2, 4  ;;  %s297_s13 = scalar_lea.hbm %s441_s1, 16  ;;  %s292_s4 = int_to_ptr.hbm [resolvable:$true] %s291_s4 }
  0x1a   : > { %s293_s5 = scalar_lea.hbm %s292_s4, 8  ;;  %p298_p2 = scmp.lt.s32.totalorder %s292_s4, %s441_s1 }
  0x1b   : > { %p294_p13 = scmp.ne.s32.totalorder %s292_s4, %s293_s5  ;;  %p299_p3 = scmp.lt.s32.totalorder %s297_s13, %s293_s5 }
  0x1d   : > { %p295_p0 = pnand %p294_p13, %p394_p5  ;;  %p300_p4 = por %p299_p3, %p298_p2 }
  0x1f   : > { %p296_p1 = pneg %p295_p0 }
  0x21   : > { %p301_p7 = pnand %p300_p4, %p296_p1 }
  0x23   : > { %304 = shalt.err (!%p301_p7)
}
  0x24   : > { %201 = dma.vmem_to_hbm [thread:$0]  (%p394_p5), %s126_s30, 128, %s128_s2, %s113_s3  }
  0x25 PF: > { %p213_p8 = scmp.ge.s32.totalorder %s343_s9, 2  ;;  %s139_s19 = sand.u32 1, %s331_s6  }
  0x26   : > { %s140_s20 = scalar_lea.sflag [#allocation4], %s139_s19 }
  0x27   : > { %p208_p9 = pnand %p213_p8, %p398_p6 }
  0x29   : > { %p209_p10 = pneg %p208_p9 }
  0x2b   : > { %326 = dma.done.wait (%p209_p10), %s140_s20, 128  }
  0x2c   : > { %328 = vsyncadd (%p209_p10), %s140_s20, 4294967168  ;;  %p12_p11 = scmp.ge.s32.totalorder %s381_s12, 4   ;;  %s444_s6 = smov %s335_s7 }
  0x2d   : > { %s445_s7 = smov %s339_s8  ;;  %s446_s8 = smov %s392_s15 }
  0x2e   : > { %s447_s9 = smov %s381_s12  ;;  %14 = sbr.rel (!%p12_p11) target bundleno = 4 (0x4), region = 61 }
  0x33   :  { %146 = vsyncpa [#allocation3], 1 }
  0x34   :  { %148 = vsyncpa [#allocation3 + $0x1], 1 }
  0x35   :  { %149 = vsyncpa [#allocation4], 1 }
  0x36   :  { %151 = vsyncpa [#allocation4 + $0x1], 1 }

// kernel: tpu_custom_call.1
= control target key start
LH: loop header
LB: loop body
LE: loop exit
PB: predicated region body
PF: predicated region fallthrough
CT: control target
= control target key end

     0   :  { %10 = vsyncpa [#allocation3], 0  ;;  %s410_s0 = inlined_call_operand.hbm [shape: bf16[8,16], index: 0, kind: input, shape index: {}]   ;;  %s411_s1 = inlined_call_operand.hbm [shape: bf16[16,128], index: 1, kind: input, shape index: {}]   ;;  %s412_s2 = inlined_call_operand.vmem [shape: f32[1,128], index: 2, kind: input, shape index: {}]   ;;  %s413_s3 = inlined_call_operand.hbm [shape: bf16[128,128], index: 3, kind: input, shape index: {}]   ;;  %s414_s4 = inlined_call_operand.vmem [shape: f32[1,128], index: 4, kind: input, shape index: {}]   ;;  %s415_s5 = inlined_call_operand.hbm [shape: f32[8,128], index: 5, kind: output, shape index: {}]  }
   0x1   :  { %11 = vsyncpa [#allocation6], 0  ;;  %s28_s20 = sshll.u32 %s411_s1, 4  ;;  %s29_s20 = int_to_ptr.hbm [resolvable:$true] %s28_s20 }
   0x2   :  { %12 = vsyncpa [#allocation4], 0  ;;  %s356_s21 = smov [#allocation5]   ;;  %s18_s25 = sshll.u32 %s410_s0, 4  ;;  %s19_s25 = int_to_ptr.hbm [resolvable:$true] %s18_s25 }
   0x3   :  { %s30_s22 = sshll.u32 %s356_s21, 4  ;;  %s357_s26 = smov 64   ;;  %s31_s22 = int_to_ptr.vmem [resolvable:$true] %s30_s22 }
   0x4   :  { %s358_s27 = smov 4   ;;  %s359_s28 = smov [#allocation2]  }
   0x5   :  { %36 = dma.hbm_to_vmem [thread:$0]  %s29_s20, 128, %s31_s22, [#allocation6], %s357_s26, %s357_s26, %s358_s27  }
   0x6   :  { %s20_s29 = sshll.u32 %s359_s28, 4  ;;  %s43_s7 = sshll.u32 %s413_s3, 4  ;;  %s21_s29 = int_to_ptr.vmem [resolvable:$true] %s20_s29  ;;  %s44_s7 = int_to_ptr.hbm [resolvable:$true] %s43_s7 }
   0x7   :  { %23 = dma.hbm_to_vmem [thread:$0]  %s19_s25, 64, %s21_s29, [#allocation3]  }
   0x8   :  { %s360_s1 = smov [#allocation7]  }
   0x9   :  { %s45_s8 = sshll.u32 %s360_s1, 4  ;;  %s46_s8 = int_to_ptr.vmem [resolvable:$true] %s45_s8 }
   0xa   :  { %51 = dma.hbm_to_vmem [thread:$0]  %s44_s7, 1024, %s46_s8, [#allocation6], %s357_s26, %s357_s26, %s358_s27  }
   0xb   :  { %350 = dma.done.wait [#allocation3], 64  }
   0xc   :  { %351 = vsyncadd [#allocation3], 4294967232 }
   0xd   :  { %352 = dma.done.wait [#allocation6], 1152  }
   0xe   :  { %353 = vsyncadd [#allocation6], 4294966144  ;;  %v237_v0 = vld [vmem:[#allocation5] sm:$0xff]  ;;  %v67_v2 = vld [vmem:[#allocation2] sm:$0xf]  ;;  %vm80_vm0 = vcmask 130048  }
   0xf   :  { %v245_v1 = vld [vmem:[#allocation7 + $0x38] sm:$0xff]  ;;  %91 = vmatpush.bf16.msra.mxu0 %v237_v0  ;;  %v244_v3 = vld [vmem:[#allocation7 + $0x30] sm:$0xff]  ;;  %v243_v4 = vld [vmem:[#allocation7 + $0x28] sm:$0xff]  ;;  %s361_s11 = smov [#allocation8]   ;;  %s189_s15 = sshll.u32 %s415_s5, 4  ;;  %s190_s15 = int_to_ptr.hbm [resolvable:$true] %s189_s15 }
  0x10   :  { %168 = vmatpush.bf16.msra.mxu1 %v245_v1  ;;  %v242_v5 = vld [vmem:[#allocation7 + $0x20] sm:$0xff]  ;;  %v241_v6 = vld [vmem:[#allocation7 + $0x18] sm:$0xff]  ;;  %v240_v7 = vld [vmem:[#allocation7 + $0x10] sm:$0xff]  ;;  %s187_s12 = sshll.u32 %s361_s11, 4  ;;  %s188_s12 = int_to_ptr.vmem [resolvable:$true] %s187_s12 }
  0x11   :  { %v239_v8 = vld [vmem:[#allocation7 + $0x8] sm:$0xff]  ;;  %v238_v9 = vld [vmem:[#allocation7] sm:$0xff]  ;;  %v252_v10 = vld [vmem:[%s412_s2] ss:$0 sm:$0xff] }
  0x12   :  { %204 = vmatmul.msk.bf16.vlgmr.msra.gmra.mxu0 %vm80_vm0, %v67_v2  ;;  %v253_v17 = vld [vmem:[%s414_s4] ss:$0 sm:$0xff] }
  0x14   :  { %169 = vmatpush.bf16.msra.mxu1 %v244_v3 }
  0x18   :  { %170 = vmatpush.bf16.msra.mxu1 %v243_v4 }
  0x1c   :  { %171 = vmatpush.bf16.msra.mxu1 %v242_v5 }
  0x20   :  { %172 = vmatpush.bf16.msra.mxu1 %v241_v6 }
  0x24   :  { %173 = vmatpush.bf16.msra.mxu1 %v240_v7 }
  0x28   :  { %174 = vmatpush.bf16.msra.mxu1 %v239_v8 }
  0x2c   :  { %175 = vmatpush.bf16.msra.mxu1 %v238_v9 }
  0x8f   :  { %v93_v11 = vpop.f32.mrf.mxu0 }
  0x90   :  { %v94_v12 = vadd.f32 %v252_v10, %v93_v11 }
  0x92   :  { %v97_v13 = vmul.f32 0.01, %v94_v12 }
  0x94   :  { %v98_v14 = vmax.f32 %v94_v12, %v97_v13 }
  0x96   :  { %v99_v15 = vpack.c.bf16 %v98_v14, %v98_v14 }
  0x97   :  { %v95_v16 = vpop.f32.mrf.mxu0 }
  0x98   :  { %176 = vmatmul.bf16.vlgmr.msra.gmra.mxu1 %v99_v15 }
 0x115   :  { %v177_v18 = vpop.f32.mrf.mxu1 }
 0x116   :  { %v178_v19 = vadd.f32 %v253_v17, %v177_v18 }
 0x118   :  { %181 = vst [vmem:[#allocation8] sm:$0xff] %v178_v19 }
 0x119   :  { %192 = dma.vmem_to_hbm [thread:$0]  %s188_s12, 128, %s190_s15, [#allocation4]  }
 0x11d   :  { %v179_v20 = vpop.f32.mrf.mxu1 }
 0x11e   :  { %354 = dma.done.wait [#allocation4], 128  }
 0x11f   :  { %355 = vsyncadd [#allocation4], 4294967168 }
 0x120   :  { %197 = vsyncpa [#allocation3], 1 }
 0x121   :  { %198 = vsyncpa [#allocation6], 1 }
 0x122   :  { %199 = vsyncpa [#allocation4], 1 }

</bundles_post_ra>
